<compile_context>
chip_gen: v6e
topology: v6e:2x2x1
jax: 0.10.0
libtpu: 0.0.40
codegen_flags: <defaults>
</compile_context>

<pallas_src>
import jax
import jax.numpy as jnp
from jax.experimental import pallas as pl
from jax.experimental.pallas import tpu as pltpu

# Module hyper-parameters (synthetic, small).
HIDDEN_SIZE = 32
OUTPUT_SIZE = 64
MAX_LENGTH = 8
DROPOUT_P = 0.1  # dropout acts as identity in eval/inference mode.

PACK_W = 128      # lane width of packed slabs / packed per-step output row
MISC_ROWS = 16    # misc slab: enc rows 0:8 | h0 row 8 | b_gru row 9 | b_out row 10 | b_ec row 11


def decoder_kernel(
    tok_ref,      # SMEM (T,) int32 : scalar-prefetched token indices
    emb_ref,      # VMEM (O, H)       embedding table (resident)
    w_ec_ref,     # VMEM (2H, 128)    [w_attn (cols 0:L) | w_comb (cols L:L+H)]
    w_gru_ref,    # VMEM (2H, 4H)     fused GRU gates, cols [r | z | gi_n | gh_n]
    w_out_ref,    # VMEM (H, O)       output projection
    misc_ref,     # VMEM (16, 128)    enc | h0 | b_gru | b_out | [b_attn|b_comb]
    out_ref,      # VMEM (T, 128)     packed per-step outputs [logp | h | aw | pad]
):
    f32 = jnp.float32
    H, O, L = HIDDEN_SIZE, OUTPUT_SIZE, MAX_LENGTH
    T = tok_ref.shape[0]

    # Deterministic pad lanes: zero the resident output block once.
    out_ref[...] = jnp.zeros_like(out_ref)

    # ---- loop-invariant loads (executed once, before the recurrence) ----
    misc = misc_ref[...]                       # (16, 128)
    enc = misc[0:L, 0:H]                       # (L, H) encoder outputs
    h = misc[L:L + 1, 0:H]                     # (1, H) initial hidden state
    b_gru = misc[9:10, :]                      # (1, 4H) fused GRU gate biases
    b_o = misc[10:11, 0:O]                     # (1, O)  output-projection bias
    bias_ec = misc[11:12, :]                   # (1, 128) [b_attn | b_comb | 0]

    w_ec = w_ec_ref[...]                       # (2H, 128)
    w_ec_e = w_ec[0:H, :]                      # emb-part of attn & combine layers
    w_attn_h = w_ec[H:2 * H, 0:L]              # (H, L) hidden-part of attention
    w_comb_h = w_ec[H:2 * H, L:L + H]          # (H, H) applied-part of combine

    w_gru = w_gru_ref[...]                     # (2H, 4H)
    w_gru_x = w_gru[0:H, :]                    # (H, 4H) x-part
    w_gru_h = w_gru[H:2 * H, :]                # (H, 4H) h-part
    w_o = w_out_ref[...]                       # (H, O)

    # ---- prologue: all embedding-dependent work, batched over the T steps ----
    # TODO(synk): training-mode stochastic dropout on `embedded` (pltpu.prng_*)
    # intentionally omitted; dropout is identity in eval mode.
    emb_rows = [emb_ref[pl.ds(tok_ref[t], 1), :] for t in range(T)]   # T x (1, H)
    emb_all = jnp.concatenate(emb_rows, axis=0)                       # (T, H)
    # One (T,H)@(H,128) dot: emb @ [W_attn_e | W_comb_e], biases pre-added.
    pre_ec = jnp.dot(emb_all, w_ec_e, preferred_element_type=f32) + bias_ec
    pre_attn = pre_ec[:, 0:L]                                         # (T, L)
    pre_comb = pre_ec[:, L:L + H]                                     # (T, H)

    # ---- statically unrolled recurrence: only h-dependent work remains ----
    for t in range(T):
        # GRU hidden-side pre-gates: depends only on h -> issues immediately,
        # overlapping the attention chain below.
        gh = jnp.dot(h, w_gru_h, preferred_element_type=f32)          # (1, 4H)

        # attention_weights = softmax(attention_layer(cat(embedded, hidden)))
        logits_a = (jnp.dot(h, w_attn_h, preferred_element_type=f32)
                    + pre_attn[t:t + 1, :])                           # (1, L)
        m_a = jnp.max(logits_a, axis=1, keepdims=True)
        e_a = jnp.exp(logits_a - m_a)
        # TODO(synk): pl.reciprocal(approx=True) would shave the divide here but
        # risks the 1e-4 tolerance on the asserted attention weights; kept exact.
        aw = e_a / jnp.sum(e_a, axis=1, keepdims=True)                # (1, L)

        # attention_applied = attention_weights @ encoder_outputs
        applied = jnp.dot(aw, enc, preferred_element_type=f32)        # (1, H)

        # relu(attention_combine(cat(embedded, applied)))
        x = jnp.maximum(
            jnp.dot(applied, w_comb_h, preferred_element_type=f32)
            + pre_comb[t:t + 1, :], 0.0)                              # (1, H)

        # Single GRU step; gate columns are [r | z | gi_n | gh_n].
        g = jnp.dot(x, w_gru_x, preferred_element_type=f32) + gh + b_gru
        r = jax.nn.sigmoid(g[:, 0:H])
        z = jax.nn.sigmoid(g[:, H:2 * H])
        n = jnp.tanh(g[:, 2 * H:3 * H] + r * g[:, 3 * H:4 * H])
        h_new = (1.0 - z) * n + z * h                                 # (1, H)

        # Output head (off the recurrence): log_softmax(out(h_new)).
        logits_o = jnp.dot(h_new, w_o, preferred_element_type=f32) + b_o
        m_o = jnp.max(logits_o, axis=1, keepdims=True)
        lse = jnp.log(jnp.sum(jnp.exp(logits_o - m_o), axis=1, keepdims=True)) + m_o
        logp = logits_o - lse                                         # (1, O)

        # Three static-lane-offset stores into the resident packed output block.
        out_ref[t:t + 1, 0:O] = logp
        out_ref[t:t + 1, O:O + H] = h_new
        out_ref[t:t + 1, O + H:O + H + L] = aw

        h = h_new


def init_params(key, hidden_size, output_size, max_length):
    """Deterministic synthetic parameters, PyTorch shapes (out_features, in_features)."""
    H, O, L = hidden_size, output_size, max_length
    ks = jax.random.split(key, 12)
    u = lambda k, shape, scale: jax.random.uniform(
        k, shape, jnp.float32, minval=-scale, maxval=scale
    )
    sH = 1.0 / jnp.sqrt(H)
    s2H = 1.0 / jnp.sqrt(2.0 * H)
    return dict(
        embedding=u(ks[0], (O, H), 1.0),
        w_attn=u(ks[1], (L, 2 * H), s2H),     # attention_layer.weight
        b_attn=u(ks[2], (L,), s2H),
        w_comb=u(ks[3], (H, 2 * H), s2H),     # attention_combine.weight
        b_comb=u(ks[4], (H,), s2H),
        w_ih=u(ks[5], (3 * H, H), sH),        # gru.weight_ih_l0  (r,z,n)
        w_hh=u(ks[6], (3 * H, H), sH),        # gru.weight_hh_l0
        b_ih=u(ks[7], (3 * H,), sH),
        b_hh=u(ks[8], (3 * H,), sH),
        w_out=u(ks[9], (O, H), sH),           # out.weight
        b_out=u(ks[10], (O,), sH),
    )


def pack_params(params):
    """One-time glue: pack PyTorch-shaped weights into lane-dense kernel slabs."""
    H, O, L = HIDDEN_SIZE, OUTPUT_SIZE, MAX_LENGTH
    p = params

    # w_ec: column-packed [attention_layer | attention_combine].
    # Rows 0:H multiply the embedding, rows H:2H multiply hidden / applied.
    w_ec = jnp.zeros((2 * H, PACK_W), jnp.float32)
    w_ec = w_ec.at[:, 0:L].set(p["w_attn"].T)
    w_ec = w_ec.at[:, L:L + H].set(p["w_comb"].T)

    # Fused GRU gate slab: rows 0:H multiply x, rows H:2H multiply h.
    W_ir = p["w_ih"][0 * H:1 * H].T
    W_iz = p["w_ih"][1 * H:2 * H].T
    W_in = p["w_ih"][2 * H:3 * H].T
    W_hr = p["w_hh"][0 * H:1 * H].T
    W_hz = p["w_hh"][1 * H:2 * H].T
    W_hn = p["w_hh"][2 * H:3 * H].T
    Z = jnp.zeros((H, H), jnp.float32)
    w_gru = jnp.concatenate(
        [jnp.concatenate([W_ir, W_iz, W_in, Z], axis=1),   # x rows
         jnp.concatenate([W_hr, W_hz, Z, W_hn], axis=1)],  # h rows
        axis=0)                                            # (2H, 4H) = (64, 128)

    w_out = p["w_out"].T                                   # (H, O)

    b_gru = jnp.concatenate([
        p["b_ih"][0 * H:1 * H] + p["b_hh"][0 * H:1 * H],   # r
        p["b_ih"][1 * H:2 * H] + p["b_hh"][1 * H:2 * H],   # z
        p["b_ih"][2 * H:3 * H],                            # gi_n bias
        p["b_hh"][2 * H:3 * H],                            # gh_n bias
    ])                                                     # (4H,) = (128,)
    biases = jnp.zeros((3, PACK_W), jnp.float32)
    biases = biases.at[0, :4 * H].set(b_gru)
    biases = biases.at[1, :O].set(p["b_out"])
    biases = biases.at[2, 0:L].set(p["b_attn"])            # matches w_ec columns
    biases = biases.at[2, L:L + H].set(p["b_comb"])
    return dict(embedding=p["embedding"], w_ec=w_ec, w_gru=w_gru,
                w_out=w_out, biases=biases)


@jax.jit
def _decode(packed, tokens, h0, enc):
    """Fused T-step decode. tokens: (T,) int32; h0: (1,H); enc: (L,H).
    Returns (log_probs (T,O), hidden_per_step (T,H), attn_weights (T,L))."""
    H, O, L = HIDDEN_SIZE, OUTPUT_SIZE, MAX_LENGTH
    T = tokens.shape[0]

    # Pack encoder outputs, initial hidden and all biases into ONE resident slab.
    misc = jnp.zeros((MISC_ROWS, PACK_W), jnp.float32)
    misc = misc.at[0:L, 0:H].set(enc)
    misc = misc.at[L:L + 1, 0:H].set(h0)
    misc = misc.at[9:12, :].set(packed["biases"])

    def const(shape):
        return pl.BlockSpec(shape, lambda i, tok_ref: (0,) * len(shape))

    grid_spec = pltpu.PrefetchScalarGridSpec(
        num_scalar_prefetch=1,
        grid=(1,),   # whole decode in one grid step; recurrence unrolled in-kernel
        in_specs=[
            const((O, H)),                 # embedding table (resident)
            const((2 * H, PACK_W)),        # w_ec slab (attn | comb)
            const((2 * H, 4 * H)),         # fused GRU gate slab
            const((H, O)),                 # output projection
            const((MISC_ROWS, PACK_W)),    # enc | h0 | biases
        ],
        out_specs=pl.BlockSpec((T, PACK_W), lambda i, tok_ref: (0, 0)),
    )
    # TODO(synk): for throughput, add a leading "parallel" batch grid axis over
    # independent sequences (fills MXU sublanes, uses both v7x TensorCores);
    # omitted to keep the module's single-sequence semantics.
    packed_out = pl.pallas_call(
        decoder_kernel,
        out_shape=jax.ShapeDtypeStruct((T, PACK_W), jnp.float32),
        grid_spec=grid_spec,
        compiler_params=pltpu.CompilerParams(
            dimension_semantics=("arbitrary",)),
    )(tokens.astype(jnp.int32),
      packed["embedding"], packed["w_ec"], packed["w_gru"],
      packed["w_out"], misc)

    logp_all = packed_out[:, 0:O]
    h_all = packed_out[:, O:O + H]
    aw_all = packed_out[:, O + H:O + H + L]
    return logp_all, h_all, aw_all


def attention_decoder_forward(packed, input_idx, hidden, encoder_outputs):
    """Exact module semantics for one step.
    input_idx: (1,) int32; hidden: (1,1,H); encoder_outputs: (L,H).
    Returns (log_probs (1,O), new_hidden (1,1,H), attention_weights (1,L))."""
    logp, h_all, aw = _decode(packed, input_idx.reshape((-1,)).astype(jnp.int32),
                              hidden[0], encoder_outputs)
    return logp, h_all[-1][None, None, :], aw


def attention_decoder_decode(packed, tokens, hidden, encoder_outputs):
    """T teacher-forced decoder steps fused into one kernel launch."""
    return _decode(packed, tokens.astype(jnp.int32), hidden[0], encoder_outputs)


def reference_forward(params, input_idx, hidden, encoder_outputs):
    """Pure-JAX reference mirroring the PyTorch forward (eval mode)."""
    H = HIDDEN_SIZE
    p = params
    embedded = p["embedding"][input_idx[0]][None, :]            # (1, H)
    h = hidden[0]                                               # (1, H)
    cat1 = jnp.concatenate([embedded, h], axis=1)               # (1, 2H)
    aw = jax.nn.softmax(cat1 @ p["w_attn"].T + p["b_attn"], axis=1)
    applied = aw @ encoder_outputs                              # (1, H)
    cat2 = jnp.concatenate([embedded, applied], axis=1)
    x = jax.nn.relu(cat2 @ p["w_comb"].T + p["b_comb"])
    gi = x @ p["w_ih"].T + p["b_ih"]
    gh = h @ p["w_hh"].T + p["b_hh"]
    r = jax.nn.sigmoid(gi[:, :H] + gh[:, :H])
    z = jax.nn.sigmoid(gi[:, H:2 * H] + gh[:, H:2 * H])
    n = jnp.tanh(gi[:, 2 * H:] + r * gh[:, 2 * H:])
    h_new = (1.0 - z) * n + z * h
    logp = jax.nn.log_softmax(h_new @ p["w_out"].T + p["b_out"], axis=1)
    return logp, h_new[None, :, :], aw


if __name__ == "__main__":
    key = jax.random.PRNGKey(0)
    k_par, k_hid, k_enc, k_tok = jax.random.split(key, 4)

    params = init_params(k_par, HIDDEN_SIZE, OUTPUT_SIZE, MAX_LENGTH)
    packed = pack_params(params)

    hidden = jax.random.normal(k_hid, (1, 1, HIDDEN_SIZE), jnp.float32)
    encoder_outputs = jax.random.normal(
        k_enc, (MAX_LENGTH, HIDDEN_SIZE), jnp.float32)

    # ---- Single decoder step: exact module semantics ----
    input_idx = jnp.array([5], dtype=jnp.int32)
    logp, new_h, attn_w = attention_decoder_forward(
        packed, input_idx, hidden, encoder_outputs)
    jax.block_until_ready((logp, new_h, attn_w))

    ref_logp, ref_h, ref_aw = reference_forward(
        params, input_idx, hidden, encoder_outputs)

    assert logp.shape == (1, OUTPUT_SIZE)
    assert new_h.shape == (1, 1, HIDDEN_SIZE)
    assert attn_w.shape == (1, MAX_LENGTH)
    assert jnp.allclose(logp, ref_logp, atol=1e-4, rtol=1e-4)
    assert jnp.allclose(new_h, ref_h, atol=1e-4, rtol=1e-4)
    assert jnp.allclose(attn_w, ref_aw, atol=1e-4, rtol=1e-4)

    # ---- Fused multi-step decode: T steps in ONE kernel launch ----
    T = 8
    tokens = jax.random.randint(k_tok, (T,), 0, OUTPUT_SIZE, dtype=jnp.int32)
    logp_all, h_all, aw_all = attention_decoder_decode(
        packed, tokens, hidden, encoder_outputs)
    jax.block_until_ready((logp_all, h_all, aw_all))

    assert logp_all.shape == (T, OUTPUT_SIZE)
    assert h_all.shape == (T, HIDDEN_SIZE)
    assert aw_all.shape == (T, MAX_LENGTH)

    h_ref = hidden
    for t in range(T):
        r_logp, h_ref, r_aw = reference_forward(
            params, tokens[t:t + 1], h_ref, encoder_outputs)
        assert jnp.allclose(logp_all[t], r_logp[0], atol=1e-4, rtol=1e-4)
        assert jnp.allclose(h_all[t], h_ref[0, 0], atol=1e-4, rtol=1e-4)
        assert jnp.allclose(aw_all[t], r_aw[0], atol=1e-4, rtol=1e-4)

    print("KERNEL_OK")
</pallas_src>

<mosaic_0001>
module attributes {stable_mosaic.version = 11 : i64} {
  func.func @decoder_kernel(%arg0: i32, %arg1: memref<1xi32, #tpu.memory_space<smem>>, %arg2: memref<64x32xf32, #tpu.memory_space<vmem>>, %arg3: memref<64x128xf32, #tpu.memory_space<vmem>>, %arg4: memref<64x128xf32, #tpu.memory_space<vmem>>, %arg5: memref<32x64xf32, #tpu.memory_space<vmem>>, %arg6: memref<16x128xf32, #tpu.memory_space<vmem>>, %arg7: memref<1x128xf32, #tpu.memory_space<vmem>>) attributes {dimension_semantics = [#tpu.dimension_semantics<arbitrary>], iteration_bounds = array<i64: 1>, scalar_prefetch = 1 : i64, scratch_operands = 0 : i64, tpu.core_type = #tpu.core_type<tc>, window_params = [{pipeline_mode = #tpu.pipeline_mode<synchronous>, transform_indices = @transform_0, window_bounds = array<i64: 64, 32>}, {pipeline_mode = #tpu.pipeline_mode<synchronous>, transform_indices = @transform_1, window_bounds = array<i64: 64, 128>}, {pipeline_mode = #tpu.pipeline_mode<synchronous>, transform_indices = @transform_2, window_bounds = array<i64: 64, 128>}, {pipeline_mode = #tpu.pipeline_mode<synchronous>, transform_indices = @transform_3, window_bounds = array<i64: 32, 64>}, {pipeline_mode = #tpu.pipeline_mode<synchronous>, transform_indices = @transform_4, window_bounds = array<i64: 16, 128>}, {pipeline_mode = #tpu.pipeline_mode<synchronous>, transform_indices = @transform_5, window_bounds = array<i64: 1, 128>}]} {
    %cst = arith.constant 0.000000e+00 : f32
    %0 = vector.broadcast %cst : f32 to vector<1x128xf32>
    %c0 = arith.constant 0 : index
    %c0_0 = arith.constant 0 : index
    %1 = vector.load %arg7[%c0, %c0_0] : memref<1x128xf32, #tpu.memory_space<vmem>>, vector<1x128xf32>
    tpu.vector_store %arg7[%c0, %c0_0], %0 {strides = array<i32>} : memref<1x128xf32, #tpu.memory_space<vmem>>, vector<1x128xf32>,
    %c0_1 = arith.constant 0 : index
    %c0_2 = arith.constant 0 : index
    %2 = vector.load %arg6[%c0_1, %c0_2] : memref<16x128xf32, #tpu.memory_space<vmem>>, vector<16x128xf32>
    %3 = vector.extract_strided_slice %2 {offsets = [0, 0], sizes = [8, 32], strides = [1, 1]} : vector<16x128xf32> to vector<8x32xf32>
    %4 = vector.extract_strided_slice %2 {offsets = [8, 0], sizes = [1, 32], strides = [1, 1]} : vector<16x128xf32> to vector<1x32xf32>
    %5 = vector.extract_strided_slice %2 {offsets = [9, 0], sizes = [1, 128], strides = [1, 1]} : vector<16x128xf32> to vector<1x128xf32>
    %6 = vector.extract_strided_slice %2 {offsets = [10, 0], sizes = [1, 64], strides = [1, 1]} : vector<16x128xf32> to vector<1x64xf32>
    %7 = vector.extract_strided_slice %2 {offsets = [11, 0], sizes = [1, 128], strides = [1, 1]} : vector<16x128xf32> to vector<1x128xf32>
    %c0_3 = arith.constant 0 : index
    %c0_4 = arith.constant 0 : index
    %8 = vector.load %arg3[%c0_3, %c0_4] : memref<64x128xf32, #tpu.memory_space<vmem>>, vector<64x128xf32>
    %9 = vector.extract_strided_slice %8 {offsets = [0, 0], sizes = [32, 128], strides = [1, 1]} : vector<64x128xf32> to vector<32x128xf32>
    %10 = vector.extract_strided_slice %8 {offsets = [32, 0], sizes = [32, 8], strides = [1, 1]} : vector<64x128xf32> to vector<32x8xf32>
    %11 = vector.extract_strided_slice %8 {offsets = [32, 8], sizes = [32, 32], strides = [1, 1]} : vector<64x128xf32> to vector<32x32xf32>
    %c0_5 = arith.constant 0 : index
    %c0_6 = arith.constant 0 : index
    %12 = vector.load %arg4[%c0_5, %c0_6] : memref<64x128xf32, #tpu.memory_space<vmem>>, vector<64x128xf32>
    %13 = vector.extract_strided_slice %12 {offsets = [0, 0], sizes = [32, 128], strides = [1, 1]} : vector<64x128xf32> to vector<32x128xf32>
    %14 = vector.extract_strided_slice %12 {offsets = [32, 0], sizes = [32, 128], strides = [1, 1]} : vector<64x128xf32> to vector<32x128xf32>
    %c0_7 = arith.constant 0 : index
    %c0_8 = arith.constant 0 : index
    %15 = vector.load %arg5[%c0_7, %c0_8] : memref<32x64xf32, #tpu.memory_space<vmem>>, vector<32x64xf32>
    %c0_9 = arith.constant 0 : index
    %16 = memref.load %arg1[%c0_9] : memref<1xi32, #tpu.memory_space<smem>>
    %17 = arith.index_cast %16 : i32 to index
    %c0_10 = arith.constant 0 : index
    %18 = vector.load %arg2[%17, %c0_10] : memref<64x32xf32, #tpu.memory_space<vmem>>, vector<1x32xf32>
    %cst_11 = arith.constant dense<0.000000e+00> : vector<1x128xf32>
    %19 = tpu.matmul %18, %9, %cst_11 {dimension_numbers = #tpu.dot_dimension_numbers<[1], [0], [0], [1], [0, 0, 1, 1], [], []>} : vector<1x32xf32>, vector<32x128xf32>, vector<1x128xf32> -> vector<1x128xf32>
    %20 = arith.addf %19, %7 : vector<1x128xf32>
    %21 = vector.extract_strided_slice %20 {offsets = [0, 0], sizes = [1, 8], strides = [1, 1]} : vector<1x128xf32> to vector<1x8xf32>
    %22 = vector.extract_strided_slice %20 {offsets = [0, 8], sizes = [1, 32], strides = [1, 1]} : vector<1x128xf32> to vector<1x32xf32>
    %cst_12 = arith.constant dense<0.000000e+00> : vector<1x128xf32>
    %23 = tpu.matmul %4, %14, %cst_12 {dimension_numbers = #tpu.dot_dimension_numbers<[1], [0], [0], [1], [0, 0, 1, 1], [], []>} : vector<1x32xf32>, vector<32x128xf32>, vector<1x128xf32> -> vector<1x128xf32>
    %cst_13 = arith.constant dense<0.000000e+00> : vector<1x8xf32>
    %24 = tpu.matmul %4, %10, %cst_13 {dimension_numbers = #tpu.dot_dimension_numbers<[1], [0], [0], [1], [0, 0, 1, 1], [], []>} : vector<1x32xf32>, vector<32x8xf32>, vector<1x8xf32> -> vector<1x8xf32>
    %25 = arith.addf %24, %21 : vector<1x8xf32>
    %cst_14 = arith.constant dense<0xFF800000> : vector<1xf32>
    %26 = vector.multi_reduction <maximumf>, %25, %cst_14 [1] : vector<1x8xf32> to vector<1xf32>
    %27 = vector.shape_cast %26 : vector<1xf32> to vector<1x1xf32>
    %28 = vector.broadcast %27 : vector<1x1xf32> to vector<1x8xf32>
    %29 = arith.subf %25, %28 : vector<1x8xf32>
    %30 = math.exp %29 : vector<1x8xf32>
    %cst_15 = arith.constant dense<0.000000e+00> : vector<1xf32>
    %31 = vector.multi_reduction <add>, %30, %cst_15 [1] : vector<1x8xf32> to vector<1xf32>
    %32 = vector.shape_cast %31 : vector<1xf32> to vector<1x1xf32>
    %33 = vector.broadcast %32 : vector<1x1xf32> to vector<1x8xf32>
    %34 = arith.divf %30, %33 : vector<1x8xf32>
    %cst_16 = arith.constant dense<0.000000e+00> : vector<1x32xf32>
    %35 = tpu.matmul %34, %3, %cst_16 {dimension_numbers = #tpu.dot_dimension_numbers<[1], [0], [0], [1], [0, 0, 1, 1], [], []>} : vector<1x8xf32>, vector<8x32xf32>, vector<1x32xf32> -> vector<1x32xf32>
    %cst_17 = arith.constant dense<0.000000e+00> : vector<1x32xf32>
    %36 = tpu.matmul %35, %11, %cst_17 {dimension_numbers = #tpu.dot_dimension_numbers<[1], [0], [0], [1], [0, 0, 1, 1], [], []>} : vector<1x32xf32>, vector<32x32xf32>, vector<1x32xf32> -> vector<1x32xf32>
    %37 = arith.addf %36, %22 : vector<1x32xf32>
    %cst_18 = arith.constant 0.000000e+00 : f32
    %38 = vector.broadcast %cst_18 : f32 to vector<1x32xf32>
    %39 = arith.maximumf %37, %38 : vector<1x32xf32>
    %cst_19 = arith.constant dense<0.000000e+00> : vector<1x128xf32>
    %40 = tpu.matmul %39, %13, %cst_19 {dimension_numbers = #tpu.dot_dimension_numbers<[1], [0], [0], [1], [0, 0, 1, 1], [], []>} : vector<1x32xf32>, vector<32x128xf32>, vector<1x128xf32> -> vector<1x128xf32>
    %41 = arith.addf %40, %23 : vector<1x128xf32>
    %42 = arith.addf %41, %5 : vector<1x128xf32>
    %43 = vector.extract_strided_slice %42 {offsets = [0, 0], sizes = [1, 32], strides = [1, 1]} : vector<1x128xf32> to vector<1x32xf32>
    %44 = arith.negf %43 : vector<1x32xf32>
    %45 = math.exp %44 : vector<1x32xf32>
    %cst_20 = arith.constant 1.000000e+00 : f32
    %46 = vector.broadcast %cst_20 : f32 to vector<1x32xf32>
    %47 = arith.addf %46, %45 : vector<1x32xf32>
    %48 = arith.divf %46, %47 : vector<1x32xf32>
    %49 = vector.extract_strided_slice %42 {offsets = [0, 32], sizes = [1, 32], strides = [1, 1]} : vector<1x128xf32> to vector<1x32xf32>
    %50 = arith.negf %49 : vector<1x32xf32>
    %51 = math.exp %50 : vector<1x32xf32>
    %cst_21 = arith.constant 1.000000e+00 : f32
    %52 = vector.broadcast %cst_21 : f32 to vector<1x32xf32>
    %53 = arith.addf %52, %51 : vector<1x32xf32>
    %54 = arith.divf %52, %53 : vector<1x32xf32>
    %55 = vector.extract_strided_slice %42 {offsets = [0, 64], sizes = [1, 32], strides = [1, 1]} : vector<1x128xf32> to vector<1x32xf32>
    %56 = vector.extract_strided_slice %42 {offsets = [0, 96], sizes = [1, 32], strides = [1, 1]} : vector<1x128xf32> to vector<1x32xf32>
    %57 = arith.mulf %48, %56 : vector<1x32xf32>
    %58 = arith.addf %55, %57 : vector<1x32xf32>
    %59 = math.tanh %58 : vector<1x32xf32>
    %cst_22 = arith.constant 1.000000e+00 : f32
    %60 = vector.broadcast %cst_22 : f32 to vector<1x32xf32>
    %61 = arith.subf %60, %54 : vector<1x32xf32>
    %62 = arith.mulf %61, %59 : vector<1x32xf32>
    %63 = arith.mulf %54, %4 : vector<1x32xf32>
    %64 = arith.addf %62, %63 : vector<1x32xf32>
    %cst_23 = arith.constant dense<0.000000e+00> : vector<1x64xf32>
    %65 = tpu.matmul %64, %15, %cst_23 {dimension_numbers = #tpu.dot_dimension_numbers<[1], [0], [0], [1], [0, 0, 1, 1], [], []>} : vector<1x32xf32>, vector<32x64xf32>, vector<1x64xf32> -> vector<1x64xf32>
    %66 = arith.addf %65, %6 : vector<1x64xf32>
    %cst_24 = arith.constant dense<0xFF800000> : vector<1xf32>
    %67 = vector.multi_reduction <maximumf>, %66, %cst_24 [1] : vector<1x64xf32> to vector<1xf32>
    %68 = vector.shape_cast %67 : vector<1xf32> to vector<1x1xf32>
    %69 = vector.broadcast %68 : vector<1x1xf32> to vector<1x64xf32>
    %70 = arith.subf %66, %69 : vector<1x64xf32>
    %71 = math.exp %70 : vector<1x64xf32>
    %cst_25 = arith.constant dense<0.000000e+00> : vector<1xf32>
    %72 = vector.multi_reduction <add>, %71, %cst_25 [1] : vector<1x64xf32> to vector<1xf32>
    %73 = vector.shape_cast %72 : vector<1xf32> to vector<1x1xf32>
    %74 = math.log %73 : vector<1x1xf32>
    %75 = arith.addf %74, %68 : vector<1x1xf32>
    %76 = vector.broadcast %75 : vector<1x1xf32> to vector<1x64xf32>
    %77 = arith.subf %66, %76 : vector<1x64xf32>
    %c0_26 = arith.constant 0 : index
    %c0_27 = arith.constant 0 : index
    %78 = vector.load %arg7[%c0_26, %c0_27] : memref<1x128xf32, #tpu.memory_space<vmem>>, vector<1x64xf32>
    tpu.vector_store %arg7[%c0_26, %c0_27], %77 {strides = array<i32>} : memref<1x128xf32, #tpu.memory_space<vmem>>, vector<1x64xf32>,
    %c0_28 = arith.constant 0 : index
    %c64 = arith.constant 64 : index
    %79 = vector.load %arg7[%c0_28, %c64] : memref<1x128xf32, #tpu.memory_space<vmem>>, vector<1x32xf32>
    tpu.vector_store %arg7[%c0_28, %c64], %64 {strides = array<i32>} : memref<1x128xf32, #tpu.memory_space<vmem>>, vector<1x32xf32>,
    %c0_29 = arith.constant 0 : index
    %c96 = arith.constant 96 : index
    %80 = vector.load %arg7[%c0_29, %c96] : memref<1x128xf32, #tpu.memory_space<vmem>>, vector<1x8xf32>
    tpu.vector_store %arg7[%c0_29, %c96], %34 {strides = array<i32>} : memref<1x128xf32, #tpu.memory_space<vmem>>, vector<1x8xf32>,
    return
  }
  func.func @transform_0(%arg0: i32, %arg1: memref<1xi32, #tpu.memory_space<smem>>) -> (i32, i32) {
    %c0_i32 = arith.constant 0 : i32
    %c0_i32_0 = arith.constant 0 : i32
    %c0_i32_1 = arith.constant 0 : i32
    return %c0_i32, %c0_i32_0 : i32, i32
  }
  func.func @transform_1(%arg0: i32, %arg1: memref<1xi32, #tpu.memory_space<smem>>) -> (i32, i32) {
    %c0_i32 = arith.constant 0 : i32
    %c0_i32_0 = arith.constant 0 : i32
    %c0_i32_1 = arith.constant 0 : i32
    return %c0_i32, %c0_i32_0 : i32, i32
  }
  func.func @transform_2(%arg0: i32, %arg1: memref<1xi32, #tpu.memory_space<smem>>) -> (i32, i32) {
    %c0_i32 = arith.constant 0 : i32
    %c0_i32_0 = arith.constant 0 : i32
    %c0_i32_1 = arith.constant 0 : i32
    return %c0_i32, %c0_i32_0 : i32, i32
  }
  func.func @transform_3(%arg0: i32, %arg1: memref<1xi32, #tpu.memory_space<smem>>) -> (i32, i32) {
    %c0_i32 = arith.constant 0 : i32
    %c0_i32_0 = arith.constant 0 : i32
    %c0_i32_1 = arith.constant 0 : i32
    return %c0_i32, %c0_i32_0 : i32, i32
  }
  func.func @transform_4(%arg0: i32, %arg1: memref<1xi32, #tpu.memory_space<smem>>) -> (i32, i32) {
    %c0_i32 = arith.constant 0 : i32
    %c0_i32_0 = arith.constant 0 : i32
    %c0_i32_1 = arith.constant 0 : i32
    return %c0_i32, %c0_i32_0 : i32, i32
  }
  func.func @transform_5(%arg0: i32, %arg1: memref<1xi32, #tpu.memory_space<smem>>) -> (i32, i32) {
    %c0_i32 = arith.constant 0 : i32
    %c0_i32_0 = arith.constant 0 : i32
    %c0_i32_1 = arith.constant 0 : i32
    return %c0_i32, %c0_i32_0 : i32, i32
  }
}

</mosaic_0001>

<bundles_post_ra>
// kernel: _decode.1
= control target key start
LH: loop header
LB: loop body
LE: loop exit
PB: predicated region body
PF: predicated region fallthrough
CT: control target
= control target key end

     0   :  { %12 = vsyncpa [#allocation5], 0  ;;  %s829_s21 = smov [#allocation4]   ;;  %s1017_s0 = inlined_call_operand.<no memory space> [shape: s32[1], index: 0, kind: input, shape index: {}]   ;;  %s1018_s1 = inlined_call_operand.vmem [shape: f32[64,32], index: 1, kind: input, shape index: {}]   ;;  %s1019_s2 = inlined_call_operand.vmem [shape: f32[64,128], index: 2, kind: input, shape index: {}]   ;;  %s1020_s3 = inlined_call_operand.vmem [shape: f32[64,128], index: 3, kind: input, shape index: {}]   ;;  %s1021_s4 = inlined_call_operand.hbm [shape: f32[32,64], index: 4, kind: input, shape index: {}]   ;;  %s1022_s5 = inlined_call_operand.vmem [shape: f32[16,128], index: 5, kind: input, shape index: {}]   ;;  %s1023_s6 = inlined_call_operand.vmem [shape: f32[1,128], index: 6, kind: output, shape index: {}]  }
   0x1   :  { %s24_s22 = sshll.u32 %s829_s21, 4  ;;  %s25_s22 = int_to_ptr.vmem [resolvable:$true] %s24_s22 }
   0x2   :  { %s815_s23 = scalar_lea.vmem %s25_s22, 512  ;;  %p820_p1 = scmp.lt.s32.totalorder %s25_s22, %s25_s22 }
   0x3   :  { %p816_p0 = scmp.ne.s32.totalorder %s25_s22, %s815_s23  ;;  %p821_p2 = scmp.lt.s32.totalorder %s815_s23, %s815_s23 }
   0x5   :  { %p822_p3 = por %p821_p2, %p820_p1 }
   0x7   :  { %p823_p4 = pnand %p822_p3, %p816_p0 }
   0x9   :  { %826 = shalt.err (!%p823_p4)
}
   0xa   :  { %s830_s24 = smov 128   ;;  %s831_s25 = smov 8  }
   0xb   :  { %30 = dma.hbm_to_vmem [thread:$0]  %s1021_s4, 512, %s25_s22, [#allocation5], %s830_s24, %s830_s24, %s831_s25  }
   0xc   :  { %827 = dma.done.wait [#allocation5], 512  }
   0xd   :  { %828 = vsyncadd [#allocation5], 4294966784  ;;  %v832_v0 = vmov 0.0   ;;  %vm833_vm0 = vmmov 0   ;;  %v42_v1 = vld [vmem:[%s1019_s2 + $0x18] sm:$0xff]  ;;  %v41_v2 = vld [vmem:[%s1019_s2 + $0x10] sm:$0xff]  ;;  %s60_s17 = scalar_lea.vmem %s1018_s1, %s1017_s0 }
   0xe   :  { %713 = vmatprep.subr.mxu0 %v832_v0  ;;  %36 = vst [vmem:[%s1023_s6] sm:$0x1] %v832_v0  ;;  %721 = vmatprep.mubr.msk.f32.mxu0 %vm833_vm0, %v832_v0  ;;  %v46_v3 = vld [vmem:[%s1019_s2 + $0x38] sm:$0xff]  ;;  %v40_v4 = vld [vmem:[%s1019_s2 + $0x8] sm:$0xff]  ;;  %s834_s18 = smov 120   ;;  %v39_v5 = vld [vmem:[%s1019_s2] sm:$0xff]  ;;  %vm65_vm1 = vcmask 261120  }
   0xf   :  { %724 = vmatprep.subr.mxu1 %v832_v0  ;;  %732 = vmatprep.mubr.msk.f32.mxu1 %vm833_vm0, %v832_v0  ;;  %v61_v6 = vld [vmem:[%s60_s17] sm:$0x1]  ;;  %v45_v7 = vld [vmem:[%s1019_s2 + $0x30] sm:$0xff]  ;;  %v44_v9 = vld [vmem:[%s1019_s2 + $0x28] sm:$0xff]  ;;  %vm281_vm2 = vcmask 57344   ;;  %vm293_vm3 = vcmask 64512  }
  0x10   :  { %714 = vmatpush3.msra.mxu0 %v42_v1  ;;  %377 = vrot.lane.b32.xlu1 %v46_v3, %s834_s18  ;;  %v43_v8 = vld [vmem:[%s1019_s2 + $0x20] sm:$0xff]  ;;  %v931_v10 = vld [vmem:[%s1022_s5 + $0x8] sm:$0xff]  ;;  %v54_v24 = vld [vmem:[%s1020_s3 + $0x38] sm:$0xff]  ;;  %s837_s19 = smov 96   ;;  %vm642_vm4 = vcmask 516096   ;;  %vm660_vm5 = vcmask 778752  }
  0x11   :  { %715 = vmatprep.subr.mxu0 %v832_v0  ;;  %v63_v11 = vrot.slane %v931_v10, 3  ;;  %v53_v25 = vld [vmem:[%s1020_s3 + $0x30] sm:$0xff]  ;;  %725 = vmatpush3.msra.mxu1 %v54_v24  ;;  %v52_v26 = vld [vmem:[%s1020_s3 + $0x28] sm:$0xff]  ;;  %v51_v27 = vld [vmem:[%s1020_s3 + $0x20] sm:$0xff]  ;;  %v534_v49 = vrot.slane %v931_v10, 1  ;;  %vm665_vm6 = vcmask 844544  }
  0x12   :  { %716 = vmatpush3.msra.mxu0 %v41_v2  ;;  %726 = vmatprep.subr.mxu1 %v832_v0  ;;  %v37_v28 = vld [vmem:[%s1022_s5] sm:$0xff]  ;;  %v50_v38 = vld [vmem:[%s1020_s3 + $0x18] sm:$0xff]  ;;  %v49_v41 = vld [vmem:[%s1020_s3 + $0x10] sm:$0xff] }
  0x13   :  { %717 = vmatprep.subr.mxu0 %v832_v0  ;;  %727 = vmatpush3.msra.mxu1 %v53_v25  ;;  %v48_v42 = vld [vmem:[%s1020_s3 + $0x8] sm:$0xff]  ;;  %v47_v43 = vld [vmem:[%s1020_s3] sm:$0xff]  ;;  %s836_s3 = smov 64   ;;  %v58_v62 = vld [vmem:[#allocation4 + $0x18] sm:$0xff] }
  0x14   :  { %718 = vmatpush3.msra.mxu0 %v40_v4  ;;  %375 = vrot.lane.b32.xlu1 %v45_v7, %s834_s18  ;;  %v57_v63 = vld [vmem:[#allocation4 + $0x10] sm:$0xff]  ;;  %v56_v1 = vld [vmem:[#allocation4 + $0x8] sm:$0xff] }
  0x15   :  { %719 = vmatprep.subr.mxu0 %v832_v0  ;;  %728 = vmatprep.subr.mxu1 %v832_v0 }
  0x16   :  { %720 = vmatpush3.msra.mxu0 %v39_v5  ;;  %729 = vmatpush3.msra.mxu1 %v52_v26 }
  0x17   :  { %722 = vmatmul.mubr.msk.f32.vlgmr.msra.gmra.mxu0 %vm65_vm1, %v61_v6  ;;  %735 = vmatprep.subr.mxu0 %v832_v0 }
  0x18   :  { %736 = vmatpush3.msra.mxu0 %v46_v3  ;;  %743 = vmatprep.mubr.msk.f32.mxu0 %vm833_vm0, %v832_v0  ;;  %v55_v3 = vld [vmem:[#allocation4] sm:$0xff] }
  0x19   :  { %737 = vmatprep.subr.mxu0 %v832_v0  ;;  %371 = vrot.lane.b32.xlu1 %v43_v8, %s834_s18 }
  0x1a   :  { %738 = vmatpush3.msra.mxu0 %v45_v7  ;;  %730 = vmatprep.subr.mxu1 %v832_v0 }
  0x1b   :  { %739 = vmatprep.subr.mxu0 %v832_v0  ;;  %731 = vmatpush3.msra.mxu1 %v51_v27 }
  0x1c   :  { %740 = vmatpush3.msra.mxu0 %v44_v9  ;;  %733 = vmatmul.mubr.msk.f32.vlgmr.msra.gmra.mxu1 %vm65_vm1, %v931_v10 }
  0x1d   :  { %741 = vmatprep.subr.mxu0 %v832_v0  ;;  %746 = vmatprep.subr.mxu1 %v832_v0 }
  0x1e   :  { %742 = vmatpush3.msra.mxu0 %v43_v8  ;;  %747 = vmatpush3.msra.mxu1 %v37_v28 }
  0x1f   :  { %744 = vmatmul.mubr.msk.f32.vlgmr.msra.gmra.mxu0 %vm65_vm1, %v931_v10  ;;  %762 = vmatprep.subr.mxu0 %v832_v0 }
  0x20   :  { %770 = vmatprep.mubr.msk.f32.mxu0 %vm833_vm0, %v832_v0  ;;  %748 = vmatprep.mubr.msk.f32.mxu1 %vm833_vm0, %v832_v0 }
  0x21   :  { %751 = vmatprep.subr.mxu1 %v832_v0  ;;  %763 = vmatpush3.msra.mxu0 %v50_v38 }
  0x22   :  { %764 = vmatprep.subr.mxu0 %v832_v0 }
  0x23   :  { %765 = vmatpush3.msra.mxu0 %v49_v41 }
  0x24   :  { %766 = vmatprep.subr.mxu0 %v832_v0 }
  0x25   :  { %767 = vmatpush3.msra.mxu0 %v48_v42 }
  0x26   :  { %768 = vmatprep.subr.mxu0 %v832_v0 }
  0x27   :  { %769 = vmatpush3.msra.mxu0 %v47_v43 }
  0x82   :  { %v378_v30 = vpop.permute.xlu1 %377 }
  0x86   :  { %v376_v33 = vpop.permute.xlu1 %375 }
  0x8b   :  { %v372_v35 = vpop.permute.xlu1 %371 }
  0xd7   :  { %v135_v12 = vpop.f32.mrf.mxu0 }
  0xd8   :  { %v136_v13 = vadd.f32 %v135_v12, %v63_v11  ;;  %v568_v12 = vrot.slane %v931_v10, 2 }
  0xd9   :  { %v723_v14 = vpop.f32.mrf.mxu0 }
  0xda   :  { %384 = vrot.lane.b32.xlu1 %v136_v13, %s834_s18 }
  0xdc   :  { %v207_v36 = vpop.f32.mrf.mxu1 }
  0xde   :  { %v734_v37 = vpop.f32.mrf.mxu1 }
  0xdf   :  { %v277_v15 = vpop.f32.mrf.mxu0 }
  0xe0   :  { %v278_v16 = vadd.f32 %v277_v15, %v136_v13 }
  0xe1   :  { %v745_v17 = vpop.f32.mrf.mxu0 }
  0xe2   :  { %v282_v18 = vsel %vm281_vm2, %v278_v16, -inf }
  0xe3   :  { %283 = vmax.xlane.f32.xlu0 %v282_v18 }
 0x14c   :  { %v385_v44 = vpop.permute.xlu1 %384 }
 0x16c   :  { %v284_v19 = vpop.xlane.xlu0 %283 }
 0x16d   :  { %v285_v20 = vsub.f32 %v278_v16, %v284_v19 }
 0x16f   :  { %v286_v21 = vmul.f32 1.442695, %v285_v20 }
 0x171   :  { %793 = vpow2.f32 %v286_v21 }
 0x17e   :  { %v794_v22 = vpop.eup %793 }
 0x17f   :  { %v288_v23 = vsel %vm281_vm2, %v794_v22, 0.0 }
 0x180   :  { %289 = vadd.xlane.f32.xlu0 %v288_v23 }
 0x196   :  { %373 = vrot.lane.b32.xlu0 %v44_v9, %s834_s18  ;;  %s835_s18 = smov 32  }
 0x209   :  { %v290_v29 = vpop.xlane.xlu0 %289 }
 0x20a   :  { %795 = vrcp.f32 %v290_v29 }
 0x20d   :  { %v374_v34 = vpop.permute.xlu0 %373 }
 0x217   :  { %v796_v31 = vpop.eup %795 }
 0x218   :  { %v966_v32 = vmul.f32 %v796_v31, %v794_v22 }
 0x21a   :  { %749 = vmatmul.mubr.msk.f32.vlgmr.msra.gmra.mxu1 %vm293_vm3, %v966_v32 }
 0x21b   :  { %752 = vmatpush3.msra.mxu1 %v378_v30  ;;  %759 = vmatprep.mubr.msk.f32.mxu1 %vm833_vm0, %v832_v0 }
 0x21c   :  { %753 = vmatprep.subr.mxu1 %v832_v0 }
 0x21d   :  { %754 = vmatpush3.msra.mxu1 %v376_v33 }
 0x21e   :  { %755 = vmatprep.subr.mxu1 %v832_v0 }
 0x21f   :  { %756 = vmatpush3.msra.mxu1 %v374_v34 }
 0x220   :  { %757 = vmatprep.subr.mxu1 %v832_v0 }
 0x221   :  { %758 = vmatpush3.msra.mxu1 %v372_v35 }
 0x222   :  { %773 = vmatprep.subr.mxu1 %v832_v0 }
 0x2da   :  { %v363_v39 = vpop.f32.mrf.mxu1 }
 0x2db   :  { %760 = vmatmul.mubr.msk.f32.vlgmr.msra.gmra.mxu1 %vm65_vm1, %v363_v39 }
 0x2dc   :  { %v750_v40 = vpop.f32.mrf.mxu1  ;;  %781 = vmatprep.mubr.msk.f32.mxu1 %vm833_vm0, %v832_v0  ;;  %774 = vmatpush3.msra.mxu1 %v58_v62 }
 0x2dd   :  { %775 = vmatprep.subr.mxu1 %v832_v0 }
 0x2de   :  { %776 = vmatpush3.msra.mxu1 %v57_v63 }
 0x2df   :  { %777 = vmatprep.subr.mxu1 %v832_v0 }
 0x2e0   :  { %778 = vmatpush3.msra.mxu1 %v56_v1 }
 0x2e1   :  { %779 = vmatprep.subr.mxu1 %v832_v0 }
 0x2e2   :  { %780 = vmatpush3.msra.mxu1 %v55_v3 }
 0x39b   :  { %v456_v45 = vpop.f32.mrf.mxu1 }
 0x39c   :  { %v457_v46 = vadd.f32 %v456_v45, %v385_v44 }
 0x39d   :  { %v761_v47 = vpop.f32.mrf.mxu1 }
 0x39e   :  { %v460_v48 = vmax.f32 %v457_v46, 0.0 }
 0x3a0   :  { %771 = vmatmul.mubr.msk.f32.vlgmr.msra.gmra.mxu0 %vm65_vm1, %v460_v48 }
 0x460   :  { %v530_v50 = vpop.f32.mrf.mxu0 }
 0x461   :  { %v531_v51 = vadd.f32 %v530_v50, %v207_v36 }
 0x462   :  { %v772_v52 = vpop.f32.mrf.mxu0 }
 0x463   :  { %v536_v53 = vadd.f32 %v534_v49, %v531_v51 }
 0x465   :  { %544 = vrot.lane.b32.xlu1 %v536_v53, %s835_s18  ;;  %v679_v54 = vmul.f32 -1.442695, %v536_v53 }
 0x467   :  { %797 = vpow2.f32 %v679_v54 }
 0x474   :  { %v798_v55 = vpop.eup %797 }
 0x475   :  { %v540_v56 = vadd.f32 1.0, %v798_v55 }
 0x477   :  { %799 = vrcp.f32 %v540_v56 }
 0x484   :  { %v800_v57 = vpop.eup %799 }
 0x485   :  { %v554_v5 = vsub.f32 1.0, %v800_v57 }
 0x4d7   :  { %v545_v58 = vpop.permute.xlu1 %544 }
 0x4d8   :  { %v547_v59 = vmul.f32 %v800_v57, %v545_v58 }
 0x4da   :  { %549 = vrot.lane.b32.xlu1 %v547_v59, %s836_s3 }
 0x54c   :  { %v550_v60 = vpop.permute.xlu1 %549 }
 0x54d   :  { %v552_v61 = vadd.f32 %v550_v60, %v536_v53 }
 0x54f   :  { %801 = vtanh.f32 %v552_v61 }
 0x55c   :  { %v802_v2 = vpop.eup %801 }
 0x55d   :  { %556 = vrot.lane.b32.xlu1 %v802_v2, %s837_s19 }
 0x561   :  { %560 = vrot.lane.b32.xlu1 %v931_v10, %s835_s18 }
 0x5cf   :  { %v557_v4 = vpop.permute.xlu1 %556 }
 0x5d0   :  { %v559_v7 = vmul.f32 %v557_v4, %v554_v5 }
 0x5d3   :  { %v561_v6 = vpop.permute.xlu1 %560 }
 0x5d4   :  { %v563_v8 = vmul.f32 %v800_v57, %v561_v6 }
 0x5d6   :  { %v564_v9 = vadd.f32 %v563_v8, %v559_v7 }
 0x5d8   :  { %566 = vrot.lane.b32.xlu0 %v564_v9, %s837_s19 }
 0x64a   :  { %v567_v11 = vpop.permute.xlu0 %566 }
 0x64b   :  { %782 = vmatmul.mubr.msk.f32.vlgmr.msra.gmra.mxu1 %vm65_vm1, %v567_v11 }
 0x70b   :  { %v638_v13 = vpop.f32.mrf.mxu1 }
 0x70c   :  { %v639_v14 = vadd.f32 %v638_v13, %v568_v12 }
 0x70d   :  { %v783_v0 = vpop.f32.mrf.mxu1 }
 0x70e   :  { %v643_v15 = vsel %vm642_vm4, %v639_v14, -inf }
 0x70f   :  { %644 = vmax.xlane.f32.xlu1 %v643_v15 }
 0x720   :  { %662 = vrot.lane.b32.xlu1 %v966_v32, %s837_s19 }
 0x798   :  { %v645_v16 = vpop.xlane.xlu1 %644 }
 0x799   :  { %v646_v17 = vsub.f32 %v639_v14, %v645_v16 }
 0x79b   :  { %v647_v18 = vmul.f32 1.442695, %v646_v17 }
 0x79c   :  { %v663_v26 = vpop.permute.xlu1 %662 }
 0x79d   :  { %803 = vpow2.f32 %v647_v18 }
 0x7aa   :  { %v804_v19 = vpop.eup %803 }
 0x7ab   :  { %v649_v20 = vsel %vm642_vm4, %v804_v19, 0.0 }
 0x7ac   :  { %650 = vadd.xlane.f32.xlu0 %v649_v20 }
 0x7c2   :  { %657 = vrot.lane.b32.xlu0 %v564_v9, %s835_s18 }
 0x835   :  { %v651_v10 = vpop.xlane.xlu0 %650 }
 0x836   :  { %805 = vlog2.f32 %v651_v10 }
 0x839   :  { %v658_v25 = vpop.permute.xlu0 %657 }
 0x843   :  { %v806_v21 = vpop.eup %805 }
 0x844   :  { %v653_v22 = vmul.f32 0.6931472, %v806_v21 }
 0x846   :  { %v654_v23 = vadd.f32 %v653_v22, %v645_v16 }
 0x848   :  { %v655_v24 = vsub.f32 %v639_v14, %v654_v23 }
 0x84a   :  { %656 = vst.msk [vmem:[%s1023_s6] sm:$0x1] %vm642_vm4, %v655_v24 }
 0x84b   :  { %661 = vst.msk [vmem:[%s1023_s6] sm:$0x1] %vm660_vm5, %v658_v25 }
 0x84c   :  { %666 = vst.msk [vmem:[%s1023_s6] sm:$0x1] %vm665_vm6, %v663_v26 }
 0x84d   :  { %671 = vsyncpa [#allocation5], 1 }

</bundles_post_ra>
